<compile_context>
chip_gen: v5e
topology: v5e:2x2
jax: 0.10.0
libtpu: 0.0.40
codegen_flags: <defaults>
</compile_context>

<pallas_src>
import functools

import jax
import jax.numpy as jnp
from jax.experimental import pallas as pl
from jax.experimental.pallas import tpu as pltpu

HIDDEN1 = 16
HIDDEN2 = 8
FOLD = 16  # batch rows folded into the lane dimension


def _round_up(n, m):
    return ((n + m - 1) // m) * m


def _choose_block(rows, target):
    """Folded rows per grid step; keep the step count even (v7x megacore)."""
    target = min(2048, max(8, _round_up(target, 8)))
    if rows <= target:
        return _round_up(rows, 8)
    steps = pl.cdiv(rows, target)
    if steps % 2:
        steps += 1  # v7x: 2 TensorCores split the parallel axis -> even steps
    return max(8, _round_up(pl.cdiv(rows, steps), 8))


def _block_diag(w, f):
    """f copies of w along the diagonal: (fin, fout) -> (f*fin, f*fout)."""
    fin, fout = w.shape
    bd = jnp.zeros((f, fin, f, fout), w.dtype)
    bd = bd.at[jnp.arange(f), :, jnp.arange(f), :].set(w)
    return bd.reshape(f * fin, f * fout)


def expert_kernel(x_ref, w1_ref, w2_ref, w3_ref, b_ref, o_ref, *, n1, n2, n3):
    x = x_ref[...]
    b_all = b_ref[...]                 # (3, bmax) f32, loaded once per step
    b1 = b_all[0:1, 0:n1]
    b2 = b_all[1:2, 0:n2]
    b3 = b_all[2:3, 0:n3]
    # MXU accumulates in f32; intermediates stay f32 (bias/ReLU on f32 VPU).
    h = jnp.dot(x, w1_ref[...], preferred_element_type=jnp.float32) + b1
    h = jnp.maximum(h, 0.0)
    h = jnp.dot(h, w2_ref[...], preferred_element_type=jnp.float32) + b2
    h = jnp.maximum(h, 0.0)
    h = jnp.dot(h, w3_ref[...], preferred_element_type=jnp.float32) + b3
    h = jnp.maximum(h, 0.0)
    o_ref[...] = h.astype(o_ref.dtype)


@functools.partial(jax.jit, static_argnames=("block_b", "fold", "compute_dtype"))
def expert_forward(x, w1, b1, w2, b2, w3, b3, *,
                   block_b=8192, fold=FOLD, compute_dtype=None):
    B, in_dim = x.shape
    h1d, h2d = w1.shape[1], w2.shape[1]
    out_dim = w3.shape[1]
    out_dtype = x.dtype
    cdt = x.dtype if compute_dtype is None else jnp.dtype(compute_dtype)
    f = fold

    # The fold reshape requires B to be a multiple of f*8 (8 = sublane
    # granularity of the folded-row axis).  Pad only when actually needed.
    b_pad = _round_up(B, f * 8)
    if b_pad != B:
        x = jnp.pad(x, ((0, b_pad - B), (0, 0)))
    if x.dtype != cdt:
        # TODO(synk): for the bf16 path, produce/cast x upstream to avoid this
        # extra HBM pass.
        x = x.astype(cdt)
    rows = b_pad // f
    xf = x.reshape(rows, f * in_dim)            # free row-major reshape

    # Block-diagonal packed weights -> lane-dense K/N for the MXU and
    # lane-dense loads/stores (n3 = f*out_dim >= 128 for out_dim >= 8).
    w1bd = _block_diag(w1, f).astype(cdt)       # (f*in,  f*h1)
    w2bd = _block_diag(w2, f).astype(cdt)       # (f*h1,  f*h2)
    w3bd = _block_diag(w3, f).astype(cdt)       # (f*h2,  f*out)

    n1, n2, n3 = f * h1d, f * h2d, f * out_dim
    bmax = max(n1, n2, n3)
    bpk = jnp.stack([
        jnp.pad(jnp.tile(b1.reshape(-1), f), (0, bmax - n1)),
        jnp.pad(jnp.tile(b2.reshape(-1), f), (0, bmax - n2)),
        jnp.pad(jnp.tile(b3.reshape(-1), f), (0, bmax - n3)),
    ]).astype(jnp.float32)                      # (3, bmax)

    blk = _choose_block(rows, max(8, block_b // f))
    grid = (pl.cdiv(rows, blk),)                # last block may be partial:
                                                # Pallas clips OOB reads/writes

    kernel = functools.partial(expert_kernel, n1=n1, n2=n2, n3=n3)
    out_f = pl.pallas_call(
        kernel,
        out_shape=jax.ShapeDtypeStruct((rows, n3), out_dtype),
        grid_spec=pltpu.PrefetchScalarGridSpec(
            num_scalar_prefetch=0,
            grid=grid,
            in_specs=[
                pl.BlockSpec((blk, f * in_dim), lambda i: (i, 0)),  # x tile
                pl.BlockSpec(w1bd.shape, lambda i: (0, 0)),         # constant
                pl.BlockSpec(w2bd.shape, lambda i: (0, 0)),
                pl.BlockSpec(w3bd.shape, lambda i: (0, 0)),
                pl.BlockSpec(bpk.shape, lambda i: (0, 0)),
            ],
            out_specs=pl.BlockSpec((blk, n3), lambda i: (i, 0)),
        ),
        compiler_params=pltpu.CompilerParams(
            dimension_semantics=("parallel",),
        ),
    )(xf, w1bd, w2bd, w3bd, bpk)

    out = out_f.reshape(b_pad, out_dim)         # free row-major reshape back
    if b_pad != B:
        out = out[:B]
    return out


def init_linear_params(key, fan_in, fan_out):
    # deterministic, PyTorch-style uniform(-1/sqrt(fan_in), 1/sqrt(fan_in))
    kw, kb = jax.random.split(key)
    bound = 1.0 / jnp.sqrt(float(fan_in))
    w = jax.random.uniform(kw, (fan_in, fan_out), jnp.float32, -bound, bound)
    b = jax.random.uniform(kb, (1, fan_out), jnp.float32, -bound, bound)
    return w, b


def reference_forward(x, w1, b1, w2, b2, w3, b3):
    h = jnp.maximum(x @ w1 + b1, 0.0)
    h = jnp.maximum(h @ w2 + b2, 0.0)
    h = jnp.maximum(h @ w3 + b3, 0.0)
    return h  # dropout in eval mode = identity


if __name__ == "__main__":
    key = jax.random.PRNGKey(0)
    k_x, k1, k2, k3 = jax.random.split(key, 4)

    batch = 16
    input_dim = 32
    output_dim = 8
    # expert_dropout only affects training mode; identity at inference.

    x = jax.random.normal(k_x, (batch, input_dim), jnp.float32)
    w1, b1 = init_linear_params(k1, input_dim, HIDDEN1)
    w2, b2 = init_linear_params(k2, HIDDEN1, HIDDEN2)
    w3, b3 = init_linear_params(k3, HIDDEN2, output_dim)

    ref = reference_forward(x, w1, b1, w2, b2, w3, b3)

    # f32 path
    out = expert_forward(x, w1, b1, w2, b2, w3, b3)
    out = jax.block_until_ready(out)
    assert out.shape == (batch, output_dim)
    assert jnp.allclose(out, ref, atol=1e-5, rtol=1e-5), "f32 mismatch vs reference"

    # bf16-load path (f32 accumulation) — bandwidth optimization, looser tolerance.
    out_bf16 = expert_forward(x, w1, b1, w2, b2, w3, b3,
                              compute_dtype=jnp.bfloat16)
    out_bf16 = jax.block_until_ready(out_bf16)
    assert jnp.allclose(out_bf16, ref, atol=5e-2, rtol=5e-2), "bf16 mismatch vs reference"

    # Ragged batch (exercises padding + fold + partial-block clipping).
    x_ragged = jax.random.normal(k_x, (37, input_dim), jnp.float32)
    ref_ragged = reference_forward(x_ragged, w1, b1, w2, b2, w3, b3)
    out_ragged = jax.block_until_ready(
        expert_forward(x_ragged, w1, b1, w2, b2, w3, b3))
    assert out_ragged.shape == (37, output_dim)
    assert jnp.allclose(out_ragged, ref_ragged, atol=1e-5, rtol=1e-5), \
        "ragged-batch mismatch vs reference"

    # Larger, fold-aligned batch: no wrapper pad/cast, multi-step (even) grid.
    x_big = jax.random.normal(k_x, (4096, input_dim), jnp.float32)
    ref_big = reference_forward(x_big, w1, b1, w2, b2, w3, b3)
    out_big = jax.block_until_ready(
        expert_forward(x_big, w1, b1, w2, b2, w3, b3, block_b=2048))
    assert jnp.allclose(out_big, ref_big, atol=1e-5, rtol=1e-5), \
        "large-batch mismatch vs reference"

    print("KERNEL_OK")
</pallas_src>

<mosaic_0001>
module attributes {stable_mosaic.version = 11 : i64} {
  func.func @expert_kernel(%arg0: i32, %arg1: memref<8x512xf32, #tpu.memory_space<vmem>>, %arg2: memref<512x256xf32, #tpu.memory_space<vmem>>, %arg3: memref<256x128xf32, #tpu.memory_space<vmem>>, %arg4: memref<128x128xf32, #tpu.memory_space<vmem>>, %arg5: memref<3x256xf32, #tpu.memory_space<vmem>>, %arg6: memref<8x128xf32, #tpu.memory_space<vmem>>) attributes {dimension_semantics = [#tpu.dimension_semantics<parallel>], iteration_bounds = array<i64: 1>, scalar_prefetch = 0 : i64, scratch_operands = 0 : i64, tpu.core_type = #tpu.core_type<tc>, window_params = [{transform_indices = @transform_0, window_bounds = array<i64: 8, 512>}, {pipeline_mode = #tpu.pipeline_mode<synchronous>, transform_indices = @transform_1, window_bounds = array<i64: 512, 256>}, {pipeline_mode = #tpu.pipeline_mode<synchronous>, transform_indices = @transform_2, window_bounds = array<i64: 256, 128>}, {pipeline_mode = #tpu.pipeline_mode<synchronous>, transform_indices = @transform_3, window_bounds = array<i64: 128, 128>}, {pipeline_mode = #tpu.pipeline_mode<synchronous>, transform_indices = @transform_4, window_bounds = array<i64: 3, 256>}, {transform_indices = @transform_5, window_bounds = array<i64: 8, 128>}]} {
    %c0 = arith.constant 0 : index
    %c0_0 = arith.constant 0 : index
    %0 = vector.load %arg1[%c0, %c0_0] : memref<8x512xf32, #tpu.memory_space<vmem>>, vector<8x512xf32>
    %c0_1 = arith.constant 0 : index
    %c0_2 = arith.constant 0 : index
    %1 = vector.load %arg5[%c0_1, %c0_2] : memref<3x256xf32, #tpu.memory_space<vmem>>, vector<3x256xf32>
    %2 = vector.extract_strided_slice %1 {offsets = [0, 0], sizes = [1, 256], strides = [1, 1]} : vector<3x256xf32> to vector<1x256xf32>
    %3 = vector.extract_strided_slice %1 {offsets = [1, 0], sizes = [1, 128], strides = [1, 1]} : vector<3x256xf32> to vector<1x128xf32>
    %4 = vector.extract_strided_slice %1 {offsets = [2, 0], sizes = [1, 128], strides = [1, 1]} : vector<3x256xf32> to vector<1x128xf32>
    %c0_3 = arith.constant 0 : index
    %c0_4 = arith.constant 0 : index
    %5 = vector.load %arg2[%c0_3, %c0_4] : memref<512x256xf32, #tpu.memory_space<vmem>>, vector<512x256xf32>
    %cst = arith.constant dense<0.000000e+00> : vector<8x256xf32>
    %6 = tpu.matmul %0, %5, %cst {dimension_numbers = #tpu.dot_dimension_numbers<[1], [0], [0], [1], [0, 0, 1, 1], [], []>} : vector<8x512xf32>, vector<512x256xf32>, vector<8x256xf32> -> vector<8x256xf32>
    %7 = vector.broadcast %2 : vector<1x256xf32> to vector<8x256xf32>
    %8 = arith.addf %6, %7 : vector<8x256xf32>
    %cst_5 = arith.constant 0.000000e+00 : f32
    %9 = vector.broadcast %cst_5 : f32 to vector<8x256xf32>
    %10 = arith.maximumf %8, %9 : vector<8x256xf32>
    %c0_6 = arith.constant 0 : index
    %c0_7 = arith.constant 0 : index
    %11 = vector.load %arg3[%c0_6, %c0_7] : memref<256x128xf32, #tpu.memory_space<vmem>>, vector<256x128xf32>
    %cst_8 = arith.constant dense<0.000000e+00> : vector<8x128xf32>
    %12 = tpu.matmul %10, %11, %cst_8 {dimension_numbers = #tpu.dot_dimension_numbers<[1], [0], [0], [1], [0, 0, 1, 1], [], []>} : vector<8x256xf32>, vector<256x128xf32>, vector<8x128xf32> -> vector<8x128xf32>
    %13 = vector.broadcast %3 : vector<1x128xf32> to vector<8x128xf32>
    %14 = arith.addf %12, %13 : vector<8x128xf32>
    %cst_9 = arith.constant 0.000000e+00 : f32
    %15 = vector.broadcast %cst_9 : f32 to vector<8x128xf32>
    %16 = arith.maximumf %14, %15 : vector<8x128xf32>
    %c0_10 = arith.constant 0 : index
    %c0_11 = arith.constant 0 : index
    %17 = vector.load %arg4[%c0_10, %c0_11] : memref<128x128xf32, #tpu.memory_space<vmem>>, vector<128x128xf32>
    %cst_12 = arith.constant dense<0.000000e+00> : vector<8x128xf32>
    %18 = tpu.matmul %16, %17, %cst_12 {dimension_numbers = #tpu.dot_dimension_numbers<[1], [0], [0], [1], [0, 0, 1, 1], [], []>} : vector<8x128xf32>, vector<128x128xf32>, vector<8x128xf32> -> vector<8x128xf32>
    %19 = vector.broadcast %4 : vector<1x128xf32> to vector<8x128xf32>
    %20 = arith.addf %18, %19 : vector<8x128xf32>
    %cst_13 = arith.constant 0.000000e+00 : f32
    %21 = vector.broadcast %cst_13 : f32 to vector<8x128xf32>
    %22 = arith.maximumf %20, %21 : vector<8x128xf32>
    %c0_14 = arith.constant 0 : index
    %c0_15 = arith.constant 0 : index
    %23 = vector.load %arg6[%c0_14, %c0_15] : memref<8x128xf32, #tpu.memory_space<vmem>>, vector<8x128xf32>
    tpu.vector_store %arg6[%c0_14, %c0_15], %22 {strides = array<i32>} : memref<8x128xf32, #tpu.memory_space<vmem>>, vector<8x128xf32>,
    return
  }
  func.func @transform_0(%arg0: i32) -> (i32, i32) {
    %c0_i32 = arith.constant 0 : i32
    %c0_i32_0 = arith.constant 0 : i32
    return %arg0, %c0_i32 : i32, i32
  }
  func.func @transform_1(%arg0: i32) -> (i32, i32) {
    %c0_i32 = arith.constant 0 : i32
    %c0_i32_0 = arith.constant 0 : i32
    %c0_i32_1 = arith.constant 0 : i32
    return %c0_i32, %c0_i32_0 : i32, i32
  }
  func.func @transform_2(%arg0: i32) -> (i32, i32) {
    %c0_i32 = arith.constant 0 : i32
    %c0_i32_0 = arith.constant 0 : i32
    %c0_i32_1 = arith.constant 0 : i32
    return %c0_i32, %c0_i32_0 : i32, i32
  }
  func.func @transform_3(%arg0: i32) -> (i32, i32) {
    %c0_i32 = arith.constant 0 : i32
    %c0_i32_0 = arith.constant 0 : i32
    %c0_i32_1 = arith.constant 0 : i32
    return %c0_i32, %c0_i32_0 : i32, i32
  }
  func.func @transform_4(%arg0: i32) -> (i32, i32) {
    %c0_i32 = arith.constant 0 : i32
    %c0_i32_0 = arith.constant 0 : i32
    %c0_i32_1 = arith.constant 0 : i32
    return %c0_i32, %c0_i32_0 : i32, i32
  }
  func.func @transform_5(%arg0: i32) -> (i32, i32) {
    %c0_i32 = arith.constant 0 : i32
    %c0_i32_0 = arith.constant 0 : i32
    return %arg0, %c0_i32 : i32, i32
  }
}

</mosaic_0001>

<bundles_post_ra>
// kernel: tile.18
= control target key start
LH: loop header
LB: loop body
LE: loop exit
PB: predicated region body
PF: predicated region fallthrough
CT: control target
= control target key end

     0   :  { %s28_s0 = inlined_call_operand.vmem [shape: f32[8], index: 0, kind: input, shape index: {}]   ;;  %s29_s1 = inlined_call_operand.vmem [shape: f32[16,8], index: 1, kind: output, shape index: {}]  }
   0x1   :  { %v4_v0 = vld [vmem:[%s28_s0] ss:$0 sm:$0xff] }
   0x2   :  { %5 = vst [vmem:[%s29_s1] sm:$0xff] %v4_v0 }
   0x3   :  { %8 = vst [vmem:[%s29_s1 + $0x8] sm:$0xff] %v4_v0 }

// kernel: tile.19
= control target key start
LH: loop header
LB: loop body
LE: loop exit
PB: predicated region body
PF: predicated region fallthrough
CT: control target
= control target key end

     0   :  { %s131_s10 = smov 120   ;;  %s132_s11 = smov 104   ;;  %vm3_vm0 = vcmask 64512   ;;  %vm9_vm1 = vcmask 1048512   ;;  %vm15_vm2 = vcmask 982912   ;;  %vm21_vm3 = vcmask 917312   ;;  %s207_s0 = inlined_call_operand.vmem [shape: f32[16,8], index: 0, kind: input, shape index: {}]   ;;  %s208_s1 = inlined_call_operand.vmem [shape: f32[128], index: 1, kind: output, shape index: {}]  }
   0x1   :  { %v101_v0 = vld [vmem:[%s207_s0 + $0xf] sm:$0x1]   ;;  %v103_v1 = vld [vmem:[%s207_s0 + $0xd] sm:$0x1]   ;;  %v105_v2 = vld [vmem:[%s207_s0 + $0xb] sm:$0x1]  }
   0x2   :  { %7 = vrot.lane.b32.xlu0 %v101_v0, %s131_s10  ;;  %19 = vrot.lane.b32.xlu1 %v103_v1, %s132_s11  ;;  %s133_s14 = smov 88   ;;  %v102_v3 = vld [vmem:[%s207_s0 + $0xe] sm:$0x1]   ;;  %v104_v4 = vld [vmem:[%s207_s0 + $0xc] sm:$0x1]   ;;  %s134_s19 = smov 112  }
   0x3   :  { %31 = vrot.lane.b32.xlu2 %v105_v2, %s133_s14  ;;  %s135_s20 = smov 96   ;;  %v106_v5 = vld [vmem:[%s207_s0 + $0xa] sm:$0x1]   ;;  %s136_s23 = smov 80   ;;  %v107_v6 = vld [vmem:[%s207_s0 + $0x9] sm:$0x1]  }
   0x4   :  { %v108_v7 = vld [vmem:[%s207_s0 + $0x8] sm:$0x1]   ;;  %s137_s28 = smov 72   ;;  %s138_s29 = smov 64   ;;  %v109_v8 = vld [vmem:[%s207_s0 + $0x7] sm:$0x1]  }
   0x5   :  { %s139_s3 = smov 56   ;;  %v110_v9 = vld [vmem:[%s207_s0 + $0x6] sm:$0x1]   ;;  %v111_v10 = vld [vmem:[%s207_s0 + $0x5] sm:$0x1]   ;;  %s140_s8 = smov 48  }
   0x6   :  { %s141_s9 = smov 40   ;;  %v112_v11 = vld [vmem:[%s207_s0 + $0x4] sm:$0x1]   ;;  %s142_s12 = smov 32   ;;  %v113_v12 = vld [vmem:[%s207_s0 + $0x3] sm:$0x1]  }
   0x7   :  { %v114_v13 = vld [vmem:[%s207_s0 + $0x2] sm:$0x1]   ;;  %s143_s17 = smov 24   ;;  %s144_s18 = smov 16   ;;  %v115_v14 = vld [vmem:[%s207_s0 + $0x1] sm:$0x1]  }
   0x8   :  { %s145_s21 = smov 8   ;;  %v2_v15 = vld [vmem:[%s207_s0] sm:$0x1]   ;;  %vm27_vm4 = vcmask 851712   ;;  %vm33_vm5 = vcmask 786112   ;;  %vm39_vm6 = vcmask 720512  }
   0x9   :  { %4 = vst.msk [vmem:[#allocation0] sm:$0x1] %vm3_vm0, %v2_v15   ;;  %vm45_vm7 = vcmask 654912   ;;  %vm51_vm8 = vcmask 589312   ;;  %vm57_vm9 = vcmask 523712   ;;  %vm63_vm10 = vcmask 458112  }
   0xa   :  { %13 = vrot.lane.b32.xlu0 %v102_v3, %s134_s19  ;;  %25 = vrot.lane.b32.xlu1 %v104_v4, %s135_s20  ;;  %vm69_vm11 = vcmask 392512   ;;  %vm75_vm12 = vcmask 326912   ;;  %vm81_vm13 = vcmask 261312   ;;  %vm87_vm14 = vcmask 195712  }
   0xb   :  { %37 = vrot.lane.b32.xlu2 %v106_v5, %s136_s23  ;;  %vm93_vm15 = vcmask 130112  }
  0x12   :  { %43 = vrot.lane.b32.xlu0 %v107_v6, %s137_s28  ;;  %49 = vrot.lane.b32.xlu1 %v108_v7, %s138_s29 }
  0x13   :  { %55 = vrot.lane.b32.xlu2 %v109_v8, %s139_s3 }
  0x1a   :  { %61 = vrot.lane.b32.xlu0 %v110_v9, %s140_s8  ;;  %67 = vrot.lane.b32.xlu1 %v111_v10, %s141_s9 }
  0x1b   :  { %73 = vrot.lane.b32.xlu2 %v112_v11, %s142_s12 }
  0x22   :  { %79 = vrot.lane.b32.xlu0 %v113_v12, %s143_s17  ;;  %85 = vrot.lane.b32.xlu1 %v114_v13, %s144_s18 }
  0x23   :  { %91 = vrot.lane.b32.xlu2 %v115_v14, %s145_s21 }
  0x5d   :  { %v32_v16 = vpop.permute.xlu2 %31  }
  0x65   :  { %v38_v17 = vpop.permute.xlu2 %37  }
  0x6d   :  { %v56_v18 = vpop.permute.xlu2 %55  }
  0x74   :  { %v8_v19 = vpop.permute.xlu0 %7   ;;  %v20_v20 = vpop.permute.xlu1 %19  }
  0x75   :  { %10 = vst.msk [vmem:[#allocation0] sm:$0x1] %vm9_vm1, %v8_v19   ;;  %v74_v21 = vpop.permute.xlu2 %73  }
  0x7c   :  { %v14_v22 = vpop.permute.xlu0 %13   ;;  %v26_v23 = vpop.permute.xlu1 %25  }
  0x7d   :  { %16 = vst.msk [vmem:[#allocation0] sm:$0x1] %vm15_vm2, %v14_v22   ;;  %v92_v24 = vpop.permute.xlu2 %91  }
  0x7e   :  { %22 = vst.msk [vmem:[#allocation0] sm:$0x1] %vm21_vm3, %v20_v20  }
  0x7f   :  { %28 = vst.msk [vmem:[#allocation0] sm:$0x1] %vm27_vm4, %v26_v23  }
  0x80   :  { %34 = vst.msk [vmem:[#allocation0] sm:$0x1] %vm33_vm5, %v32_v16  }
  0x81   :  { %40 = vst.msk [vmem:[#allocation0] sm:$0x1] %vm39_vm6, %v38_v17  }
  0x84   :  { %v44_v25 = vpop.permute.xlu0 %43   ;;  %v50_v26 = vpop.permute.xlu1 %49  }
  0x85   :  { %46 = vst.msk [vmem:[#allocation0] sm:$0x1] %vm45_vm7, %v44_v25  }
  0x86   :  { %52 = vst.msk [vmem:[#allocation0] sm:$0x1] %vm51_vm8, %v50_v26  }
  0x87   :  { %58 = vst.msk [vmem:[#allocation0] sm:$0x1] %vm57_vm9, %v56_v18  }
  0x8c   :  { %v62_v27 = vpop.permute.xlu0 %61   ;;  %v68_v28 = vpop.permute.xlu1 %67  }
  0x8d   :  { %64 = vst.msk [vmem:[#allocation0] sm:$0x1] %vm63_vm10, %v62_v27  }
  0x8e   :  { %70 = vst.msk [vmem:[#allocation0] sm:$0x1] %vm69_vm11, %v68_v28  }
  0x8f   :  { %76 = vst.msk [vmem:[#allocation0] sm:$0x1] %vm75_vm12, %v74_v21  }
  0x94   :  { %v80_v29 = vpop.permute.xlu0 %79   ;;  %v86_v30 = vpop.permute.xlu1 %85  }
  0x95   :  { %82 = vst.msk [vmem:[#allocation0] sm:$0x1] %vm81_vm13, %v80_v29  }
  0x96   :  { %88 = vst.msk [vmem:[#allocation0] sm:$0x1] %vm87_vm14, %v86_v30  }
  0x97   :  { %94 = vst.msk [vmem:[#allocation0] sm:$0x1] %vm93_vm15, %v92_v24  }
  0x9e   :  { %v97_v31 = vld [vmem:[#allocation0] sm:$0x1] }
  0x9f   :  { %100 = vst [vmem:[%s208_s1] sm:$0x1] %v97_v31 }

// kernel: tile.14
= control target key start
LH: loop header
LB: loop body
LE: loop exit
PB: predicated region body
PF: predicated region fallthrough
CT: control target
= control target key end

     0   :  { %s28_s0 = inlined_call_operand.vmem [shape: f32[16], index: 0, kind: input, shape index: {}]   ;;  %s29_s1 = inlined_call_operand.vmem [shape: f32[16,16], index: 1, kind: output, shape index: {}]  }
   0x1   :  { %v4_v0 = vld [vmem:[%s28_s0] ss:$0 sm:$0xff] }
   0x2   :  { %5 = vst [vmem:[%s29_s1] sm:$0xff] %v4_v0 }
   0x3   :  { %8 = vst [vmem:[%s29_s1 + $0x8] sm:$0xff] %v4_v0 }

// kernel: expert_forward.1
= control target key start
LH: loop header
LB: loop body
LE: loop exit
PB: predicated region body
PF: predicated region fallthrough
CT: control target
= control target key end

     0   :  { %s1021_s1 = inlined_call_operand.vmem [shape: f32[512,256], index: 1, kind: input, shape index: {}]   ;;  %s1022_s0 = inlined_call_operand.vmem [shape: f32[8,512], index: 0, kind: input, shape index: {}]   ;;  %s1023_s2 = inlined_call_operand.vmem [shape: f32[256,128], index: 2, kind: input, shape index: {}]   ;;  %s1024_s3 = inlined_call_operand.vmem [shape: f32[128,128], index: 3, kind: input, shape index: {}]   ;;  %s1025_s4 = inlined_call_operand.vmem [shape: f32[3,256], index: 4, kind: input, shape index: {}]   ;;  %s1026_s5 = inlined_call_operand.vmem [shape: f32[8,128], index: 5, kind: output, shape index: {}]  }
   0x1   :  { %v119_v0 = vld [vmem:[%s1021_s1 + $0x2f0] sm:$0xff]  ;;  %v117_v2 = vld [vmem:[%s1021_s1 + $0x2e0] sm:$0xff]  ;;  %v120_v62 = vld [vmem:[%s1021_s1 + $0x2f8] sm:$0xff] }
   0x2   :  { %v55_v1 = vld [vmem:[%s1021_s1 + $0xf0] sm:$0xff]  ;;  %200 = vmatpush.msra.mxu2 %v119_v0  ;;  %v53_v4 = vld [vmem:[%s1021_s1 + $0xe0] sm:$0xff]  ;;  %v56_v0 = vld [vmem:[%s1021_s1 + $0xf8] sm:$0xff] }
   0x3   :  { %160 = vmatpush.msra.mxu0 %v55_v1  ;;  %v151_v3 = vld [vmem:[%s1021_s1 + $0x3f0] sm:$0xff]  ;;  %v149_v7 = vld [vmem:[%s1021_s1 + $0x3e0] sm:$0xff]  ;;  %v152_v1 = vld [vmem:[%s1021_s1 + $0x3f8] sm:$0xff] }
   0x4   :  { %v87_v5 = vld [vmem:[%s1021_s1 + $0x1f0] sm:$0xff]  ;;  %220 = vmatpush.msra.mxu3 %v151_v3  ;;  %201 = vmatpush.msra.mxu2 %v117_v2  ;;  %v85_v9 = vld [vmem:[%s1021_s1 + $0x1e0] sm:$0xff]  ;;  %v118_v2 = vld [vmem:[%s1021_s1 + $0x2e8] sm:$0xff] }
   0x5   :  { %180 = vmatpush.msra.mxu1 %v87_v5  ;;  %v115_v6 = vld [vmem:[%s1021_s1 + $0x2d0] sm:$0xff]  ;;  %161 = vmatpush.msra.mxu0 %v53_v4  ;;  %v113_v11 = vld [vmem:[%s1021_s1 + $0x2c0] sm:$0xff]  ;;  %v54_v4 = vld [vmem:[%s1021_s1 + $0xe8] sm:$0xff] }
   0x6   :  { %v51_v8 = vld [vmem:[%s1021_s1 + $0xd0] sm:$0xff]  ;;  %221 = vmatpush.msra.mxu3 %v149_v7  ;;  %v49_v12 = vld [vmem:[%s1021_s1 + $0xc0] sm:$0xff]  ;;  %202 = vmatpush.msra.mxu2 %v115_v6  ;;  %v88_v5 = vld [vmem:[%s1021_s1 + $0x1f8] sm:$0xff] }
   0x7   :  { %v147_v10 = vld [vmem:[%s1021_s1 + $0x3d0] sm:$0xff]  ;;  %181 = vmatpush.msra.mxu1 %v85_v9  ;;  %162 = vmatpush.msra.mxu0 %v51_v8  ;;  %v145_v14 = vld [vmem:[%s1021_s1 + $0x3c0] sm:$0xff]  ;;  %v116_v6 = vld [vmem:[%s1021_s1 + $0x2d8] sm:$0xff] }
   0x8   :  { %v83_v13 = vld [vmem:[%s1021_s1 + $0x1d0] sm:$0xff]  ;;  %v81_v15 = vld [vmem:[%s1021_s1 + $0x1c0] sm:$0xff]  ;;  %222 = vmatpush.msra.mxu3 %v147_v10  ;;  %203 = vmatpush.msra.mxu2 %v113_v11  ;;  %v150_v7 = vld [vmem:[%s1021_s1 + $0x3e8] sm:$0xff] }
   0x9   :  { %182 = vmatpush.msra.mxu1 %v83_v13  ;;  %v111_v16 = vld [vmem:[%s1021_s1 + $0x2b0] sm:$0xff]  ;;  %163 = vmatpush.msra.mxu0 %v49_v12  ;;  %v109_v20 = vld [vmem:[%s1021_s1 + $0x2a0] sm:$0xff]  ;;  %v52_v8 = vld [vmem:[%s1021_s1 + $0xd8] sm:$0xff] }
   0xa   :  { %v47_v17 = vld [vmem:[%s1021_s1 + $0xb0] sm:$0xff]  ;;  %223 = vmatpush.msra.mxu3 %v145_v14  ;;  %v45_v21 = vld [vmem:[%s1021_s1 + $0xa0] sm:$0xff]  ;;  %204 = vmatpush.msra.mxu2 %v111_v16  ;;  %v86_v9 = vld [vmem:[%s1021_s1 + $0x1e8] sm:$0xff] }
   0xb   :  { %v143_v18 = vld [vmem:[%s1021_s1 + $0x3b0] sm:$0xff]  ;;  %183 = vmatpush.msra.mxu1 %v81_v15  ;;  %164 = vmatpush.msra.mxu0 %v47_v17  ;;  %v141_v22 = vld [vmem:[%s1021_s1 + $0x3a0] sm:$0xff]  ;;  %v114_v10 = vld [vmem:[%s1021_s1 + $0x2c8] sm:$0xff] }
   0xc   :  { %v79_v19 = vld [vmem:[%s1021_s1 + $0x1b0] sm:$0xff]  ;;  %v77_v23 = vld [vmem:[%s1021_s1 + $0x1a0] sm:$0xff]  ;;  %224 = vmatpush.msra.mxu3 %v143_v18  ;;  %205 = vmatpush.msra.mxu2 %v109_v20  ;;  %v148_v11 = vld [vmem:[%s1021_s1 + $0x3d8] sm:$0xff] }
   0xd   :  { %184 = vmatpush.msra.mxu1 %v79_v19  ;;  %v107_v24 = vld [vmem:[%s1021_s1 + $0x290] sm:$0xff]  ;;  %165 = vmatpush.msra.mxu0 %v45_v21  ;;  %v105_v28 = vld [vmem:[%s1021_s1 + $0x280] sm:$0xff]  ;;  %v50_v12 = vld [vmem:[%s1021_s1 + $0xc8] sm:$0xff] }
   0xe   :  { %v43_v25 = vld [vmem:[%s1021_s1 + $0x90] sm:$0xff]  ;;  %225 = vmatpush.msra.mxu3 %v141_v22  ;;  %v41_v29 = vld [vmem:[%s1021_s1 + $0x80] sm:$0xff]  ;;  %206 = vmatpush.msra.mxu2 %v107_v24  ;;  %v84_v13 = vld [vmem:[%s1021_s1 + $0x1d8] sm:$0xff] }
   0xf   :  { %v139_v26 = vld [vmem:[%s1021_s1 + $0x390] sm:$0xff]  ;;  %185 = vmatpush.msra.mxu1 %v77_v23  ;;  %166 = vmatpush.msra.mxu0 %v43_v25  ;;  %v137_v30 = vld [vmem:[%s1021_s1 + $0x380] sm:$0xff]  ;;  %v112_v14 = vld [vmem:[%s1021_s1 + $0x2b8] sm:$0xff] }
  0x10   :  { %v75_v27 = vld [vmem:[%s1021_s1 + $0x190] sm:$0xff]  ;;  %v73_v31 = vld [vmem:[%s1021_s1 + $0x180] sm:$0xff]  ;;  %226 = vmatpush.msra.mxu3 %v139_v26  ;;  %207 = vmatpush.msra.mxu2 %v105_v28  ;;  %v146_v15 = vld [vmem:[%s1021_s1 + $0x3c8] sm:$0xff] }
  0x11   :  { %186 = vmatpush.msra.mxu1 %v75_v27  ;;  %v103_v32 = vld [vmem:[%s1021_s1 + $0x270] sm:$0xff]  ;;  %167 = vmatpush.msra.mxu0 %v41_v29  ;;  %v101_v36 = vld [vmem:[%s1021_s1 + $0x260] sm:$0xff]  ;;  %v48_v16 = vld [vmem:[%s1021_s1 + $0xb8] sm:$0xff] }
  0x12   :  { %v39_v33 = vld [vmem:[%s1021_s1 + $0x70] sm:$0xff]  ;;  %227 = vmatpush.msra.mxu3 %v137_v30  ;;  %v37_v37 = vld [vmem:[%s1021_s1 + $0x60] sm:$0xff]  ;;  %208 = vmatpush.msra.mxu2 %v103_v32  ;;  %v82_v17 = vld [vmem:[%s1021_s1 + $0x1c8] sm:$0xff] }
  0x13   :  { %v135_v34 = vld [vmem:[%s1021_s1 + $0x370] sm:$0xff]  ;;  %187 = vmatpush.msra.mxu1 %v73_v31  ;;  %168 = vmatpush.msra.mxu0 %v39_v33  ;;  %v133_v38 = vld [vmem:[%s1021_s1 + $0x360] sm:$0xff]  ;;  %v110_v18 = vld [vmem:[%s1021_s1 + $0x2a8] sm:$0xff] }
  0x14   :  { %v71_v35 = vld [vmem:[%s1021_s1 + $0x170] sm:$0xff]  ;;  %v69_v39 = vld [vmem:[%s1021_s1 + $0x160] sm:$0xff]  ;;  %228 = vmatpush.msra.mxu3 %v135_v34  ;;  %209 = vmatpush.msra.mxu2 %v101_v36  ;;  %v144_v19 = vld [vmem:[%s1021_s1 + $0x3b8] sm:$0xff] }
  0x15   :  { %188 = vmatpush.msra.mxu1 %v71_v35  ;;  %v99_v40 = vld [vmem:[%s1021_s1 + $0x250] sm:$0xff]  ;;  %169 = vmatpush.msra.mxu0 %v37_v37  ;;  %v97_v44 = vld [vmem:[%s1021_s1 + $0x240] sm:$0xff]  ;;  %v46_v20 = vld [vmem:[%s1021_s1 + $0xa8] sm:$0xff] }
  0x16   :  { %v35_v41 = vld [vmem:[%s1021_s1 + $0x50] sm:$0xff]  ;;  %229 = vmatpush.msra.mxu3 %v133_v38  ;;  %v33_v45 = vld [vmem:[%s1021_s1 + $0x40] sm:$0xff]  ;;  %210 = vmatpush.msra.mxu2 %v99_v40  ;;  %v80_v21 = vld [vmem:[%s1021_s1 + $0x1b8] sm:$0xff] }
  0x17   :  { %v131_v42 = vld [vmem:[%s1021_s1 + $0x350] sm:$0xff]  ;;  %189 = vmatpush.msra.mxu1 %v69_v39  ;;  %170 = vmatpush.msra.mxu0 %v35_v41  ;;  %v129_v46 = vld [vmem:[%s1021_s1 + $0x340] sm:$0xff]  ;;  %v108_v22 = vld [vmem:[%s1021_s1 + $0x298] sm:$0xff] }
  0x18   :  { %v67_v43 = vld [vmem:[%s1021_s1 + $0x150] sm:$0xff]  ;;  %v65_v47 = vld [vmem:[%s1021_s1 + $0x140] sm:$0xff]  ;;  %230 = vmatpush.msra.mxu3 %v131_v42  ;;  %211 = vmatpush.msra.mxu2 %v97_v44  ;;  %v142_v23 = vld [vmem:[%s1021_s1 + $0x3a8] sm:$0xff] }
  0x19   :  { %190 = vmatpush.msra.mxu1 %v67_v43  ;;  %v95_v48 = vld [vmem:[%s1021_s1 + $0x230] sm:$0xff]  ;;  %171 = vmatpush.msra.mxu0 %v33_v45  ;;  %v93_v52 = vld [vmem:[%s1021_s1 + $0x220] sm:$0xff]  ;;  %v44_v24 = vld [vmem:[%s1021_s1 + $0x98] sm:$0xff] }
  0x1a   :  { %v31_v49 = vld [vmem:[%s1021_s1 + $0x30] sm:$0xff]  ;;  %231 = vmatpush.msra.mxu3 %v129_v46  ;;  %v29_v53 = vld [vmem:[%s1021_s1 + $0x20] sm:$0xff]  ;;  %212 = vmatpush.msra.mxu2 %v95_v48  ;;  %v78_v25 = vld [vmem:[%s1021_s1 + $0x1a8] sm:$0xff] }
  0x1b   :  { %v127_v50 = vld [vmem:[%s1021_s1 + $0x330] sm:$0xff]  ;;  %191 = vmatpush.msra.mxu1 %v65_v47  ;;  %172 = vmatpush.msra.mxu0 %v31_v49  ;;  %v125_v54 = vld [vmem:[%s1021_s1 + $0x320] sm:$0xff]  ;;  %v106_v26 = vld [vmem:[%s1021_s1 + $0x288] sm:$0xff] }
  0x1c   :  { %v63_v51 = vld [vmem:[%s1021_s1 + $0x130] sm:$0xff]  ;;  %v61_v55 = vld [vmem:[%s1021_s1 + $0x120] sm:$0xff]  ;;  %232 = vmatpush.msra.mxu3 %v127_v50  ;;  %213 = vmatpush.msra.mxu2 %v93_v52  ;;  %v140_v27 = vld [vmem:[%s1021_s1 + $0x398] sm:$0xff] }
  0x1d   :  { %192 = vmatpush.msra.mxu1 %v63_v51  ;;  %v91_v56 = vld [vmem:[%s1021_s1 + $0x210] sm:$0xff]  ;;  %173 = vmatpush.msra.mxu0 %v29_v53  ;;  %v89_v60 = vld [vmem:[%s1021_s1 + $0x200] sm:$0xff]  ;;  %v42_v28 = vld [vmem:[%s1021_s1 + $0x88] sm:$0xff] }
  0x1e   :  { %v27_v57 = vld [vmem:[%s1021_s1 + $0x10] sm:$0xff]  ;;  %233 = vmatpush.msra.mxu3 %v125_v54  ;;  %v25_v61 = vld [vmem:[%s1021_s1] sm:$0xff]  ;;  %214 = vmatpush.msra.mxu2 %v91_v56  ;;  %v76_v29 = vld [vmem:[%s1021_s1 + $0x198] sm:$0xff] }
  0x1f   :  { %v123_v58 = vld [vmem:[%s1021_s1 + $0x310] sm:$0xff]  ;;  %193 = vmatpush.msra.mxu1 %v61_v55  ;;  %174 = vmatpush.msra.mxu0 %v27_v57  ;;  %v121_v63 = vld [vmem:[%s1021_s1 + $0x300] sm:$0xff]  ;;  %v104_v30 = vld [vmem:[%s1021_s1 + $0x278] sm:$0xff] }
  0x20   :  { %v59_v59 = vld [vmem:[%s1021_s1 + $0x110] sm:$0xff]  ;;  %234 = vmatpush.msra.mxu3 %v123_v58  ;;  %215 = vmatpush.msra.mxu2 %v89_v60  ;;  %v57_v3 = vld [vmem:[%s1021_s1 + $0x100] sm:$0xff]  ;;  %v138_v31 = vld [vmem:[%s1021_s1 + $0x388] sm:$0xff] }
  0x21   :  { %194 = vmatpush.msra.mxu1 %v59_v59  ;;  %175 = vmatpush.msra.mxu0 %v25_v61  ;;  %v40_v32 = vld [vmem:[%s1021_s1 + $0x78] sm:$0xff]  ;;  %v74_v33 = vld [vmem:[%s1021_s1 + $0x188] sm:$0xff]  ;;  %v22_v44 = vld [vmem:[%s1022_s0 + $0x10] sm:$0xff] }
  0x22   :  { %280 = vmatpush.msrb.mxu2 %v120_v62  ;;  %235 = vmatpush.msra.mxu3 %v121_v63  ;;  %v102_v34 = vld [vmem:[%s1021_s1 + $0x268] sm:$0xff]  ;;  %v136_v35 = vld [vmem:[%s1021_s1 + $0x378] sm:$0xff]  ;;  %v20_v49 = vld [vmem:[%s1022_s0] sm:$0xff] }
  0x23   :  { %240 = vmatpush.msrb.mxu0 %v56_v0  ;;  %195 = vmatpush.msra.mxu1 %v57_v3  ;;  %v38_v36 = vld [vmem:[%s1021_s1 + $0x68] sm:$0xff]  ;;  %v72_v37 = vld [vmem:[%s1021_s1 + $0x178] sm:$0xff] }
  0x24   :  { %300 = vmatpush.msrb.mxu3 %v152_v1  ;;  %281 = vmatpush.msrb.mxu2 %v118_v2  ;;  %v100_v38 = vld [vmem:[%s1021_s1 + $0x258] sm:$0xff]  ;;  %v134_v39 = vld [vmem:[%s1021_s1 + $0x368] sm:$0xff] }
  0x25   :  { %241 = vmatpush.msrb.mxu0 %v54_v4  ;;  %260 = vmatpush.msrb.mxu1 %v88_v5  ;;  %v36_v40 = vld [vmem:[%s1021_s1 + $0x58] sm:$0xff]  ;;  %v70_v41 = vld [vmem:[%s1021_s1 + $0x168] sm:$0xff]  ;;  %v336_v5 = vld [vmem:[%s1023_s2 + $0x70] sm:$0xff] }
  0x26   :  { %282 = vmatpush.msrb.mxu2 %v116_v6  ;;  %301 = vmatpush.msrb.mxu3 %v150_v7  ;;  %v98_v42 = vld [vmem:[%s1021_s1 + $0x248] sm:$0xff]  ;;  %v132_v43 = vld [vmem:[%s1021_s1 + $0x358] sm:$0xff] }
  0x27   :  { %242 = vmatpush.msrb.mxu0 %v52_v8  ;;  %261 = vmatpush.msrb.mxu1 %v86_v9  ;;  %v34_v45 = vld [vmem:[%s1021_s1 + $0x48] sm:$0xff]  ;;  %v68_v46 = vld [vmem:[%s1021_s1 + $0x158] sm:$0xff]  ;;  %v352_v8 = vld [vmem:[%s1023_s2 + $0xf0] sm:$0xff] }
  0x28   :  { %283 = vmatpush.msrb.mxu2 %v114_v10  ;;  %302 = vmatpush.msrb.mxu3 %v148_v11  ;;  %v96_v47 = vld [vmem:[%s1021_s1 + $0x238] sm:$0xff]  ;;  %v130_v48 = vld [vmem:[%s1021_s1 + $0x348] sm:$0xff]  ;;  %v334_v9 = vld [vmem:[%s1023_s2 + $0x60] sm:$0xff] }
  0x29   :  { %243 = vmatpush.msrb.mxu0 %v50_v12  ;;  %262 = vmatpush.msrb.mxu1 %v84_v13  ;;  %v23_v50 = vld [vmem:[%s1022_s0 + $0x18] sm:$0xff]  ;;  %v66_v52 = vld [vmem:[%s1021_s1 + $0x148] sm:$0xff]  ;;  %v350_v12 = vld [vmem:[%s1023_s2 + $0xe0] sm:$0xff] }
  0x2a   :  { %284 = vmatpush.msrb.mxu2 %v112_v14  ;;  %303 = vmatpush.msrb.mxu3 %v146_v15  ;;  %v32_v51 = vld [vmem:[%s1021_s1 + $0x38] sm:$0xff]  ;;  %v94_v53 = vld [vmem:[%s1021_s1 + $0x228] sm:$0xff]  ;;  %v332_v13 = vld [vmem:[%s1023_s2 + $0x50] sm:$0xff] }
  0x2b   :  { %244 = vmatpush.msrb.mxu0 %v48_v16  ;;  %263 = vmatpush.msrb.mxu1 %v82_v17  ;;  %v128_v54 = vld [vmem:[%s1021_s1 + $0x338] sm:$0xff]  ;;  %v21_v55 = vld [vmem:[%s1022_s0 + $0x8] sm:$0xff]  ;;  %v348_v16 = vld [vmem:[%s1023_s2 + $0xd0] sm:$0xff] }
  0x2c   :  { %285 = vmatpush.msrb.mxu2 %v110_v18  ;;  %304 = vmatpush.msrb.mxu3 %v144_v19  ;;  %v30_v56 = vld [vmem:[%s1021_s1 + $0x28] sm:$0xff]  ;;  %v64_v57 = vld [vmem:[%s1021_s1 + $0x138] sm:$0xff]  ;;  %v330_v17 = vld [vmem:[%s1023_s2 + $0x40] sm:$0xff] }
  0x2d   :  { %245 = vmatpush.msrb.mxu0 %v46_v20  ;;  %264 = vmatpush.msrb.mxu1 %v80_v21  ;;  %v92_v58 = vld [vmem:[%s1021_s1 + $0x218] sm:$0xff]  ;;  %v126_v59 = vld [vmem:[%s1021_s1 + $0x328] sm:$0xff]  ;;  %v328_v19 = vld [vmem:[%s1023_s2 + $0x30] sm:$0xff] }
  0x2e   :  { %286 = vmatpush.msrb.mxu2 %v108_v22  ;;  %305 = vmatpush.msrb.mxu3 %v142_v23  ;;  %v28_v60 = vld [vmem:[%s1021_s1 + $0x18] sm:$0xff]  ;;  %v62_v61 = vld [vmem:[%s1021_s1 + $0x128] sm:$0xff]  ;;  %v326_v22 = vld [vmem:[%s1023_s2 + $0x20] sm:$0xff] }
  0x2f   :  { %246 = vmatpush.msrb.mxu0 %v44_v24  ;;  %265 = vmatpush.msrb.mxu1 %v78_v25  ;;  %v90_v62 = vld [vmem:[%s1021_s1 + $0x208] sm:$0xff]  ;;  %v124_v63 = vld [vmem:[%s1021_s1 + $0x318] sm:$0xff]  ;;  %v346_v23 = vld [vmem:[%s1023_s2 + $0xc0] sm:$0xff] }
  0x30   :  { %287 = vmatpush.msrb.mxu2 %v106_v26  ;;  %306 = vmatpush.msrb.mxu3 %v140_v27  ;;  %v26_v0 = vld [vmem:[%s1021_s1 + $0x8] sm:$0xff]  ;;  %v60_v1 = vld [vmem:[%s1021_s1 + $0x118] sm:$0xff]  ;;  %v324_v26 = vld [vmem:[%s1023_s2 + $0x10] sm:$0xff] }
  0x31   :  { %247 = vmatpush.msrb.mxu0 %v42_v28  ;;  %266 = vmatpush.msrb.mxu1 %v76_v29  ;;  %v122_v2 = vld [vmem:[%s1021_s1 + $0x308] sm:$0xff]  ;;  %v337_v4 = vld [vmem:[%s1023_s2 + $0x78] sm:$0xff]  ;;  %v344_v27 = vld [vmem:[%s1023_s2 + $0xb0] sm:$0xff] }
  0x32   :  { %288 = vmatpush.msrb.mxu2 %v104_v30  ;;  %307 = vmatpush.msrb.mxu3 %v138_v31  ;;  %v58_v3 = vld [vmem:[%s1021_s1 + $0x108] sm:$0xff]  ;;  %v353_v6 = vld [vmem:[%s1023_s2 + $0xf8] sm:$0xff]  ;;  %v322_v30 = vld [vmem:[%s1023_s2] sm:$0xff] }
  0x33   :  { %248 = vmatpush.msrb.mxu0 %v40_v32  ;;  %267 = vmatpush.msrb.mxu1 %v74_v33  ;;  %v335_v7 = vld [vmem:[%s1023_s2 + $0x68] sm:$0xff]  ;;  %v333_v11 = vld [vmem:[%s1023_s2 + $0x58] sm:$0xff]  ;;  %v342_v31 = vld [vmem:[%s1023_s2 + $0xa0] sm:$0xff] }
  0x34   :  { %289 = vmatpush.msrb.mxu2 %v102_v34  ;;  %308 = vmatpush.msrb.mxu3 %v136_v35  ;;  %v351_v10 = vld [vmem:[%s1023_s2 + $0xe8] sm:$0xff]  ;;  %v349_v14 = vld [vmem:[%s1023_s2 + $0xd8] sm:$0xff]  ;;  %v340_v33 = vld [vmem:[%s1023_s2 + $0x90] sm:$0xff] }
  0x35   :  { %249 = vmatpush.msrb.mxu0 %v38_v36  ;;  %268 = vmatpush.msrb.mxu1 %v72_v37  ;;  %v331_v15 = vld [vmem:[%s1023_s2 + $0x48] sm:$0xff]  ;;  %v329_v18 = vld [vmem:[%s1023_s2 + $0x38] sm:$0xff]  ;;  %v338_v35 = vld [vmem:[%s1023_s2 + $0x80] sm:$0xff] }
  0x36   :  { %290 = vmatpush.msrb.mxu2 %v100_v38  ;;  %309 = vmatpush.msrb.mxu3 %v134_v39  ;;  %v327_v20 = vld [vmem:[%s1023_s2 + $0x28] sm:$0xff]  ;;  %v325_v24 = vld [vmem:[%s1023_s2 + $0x18] sm:$0xff]  ;;  %v410_v37 = vld [vmem:[%s1024_s3 + $0x70] sm:$0xff] }
  0x37   :  { %250 = vmatpush.msrb.mxu0 %v36_v40  ;;  %269 = vmatpush.msrb.mxu1 %v70_v41  ;;  %v347_v21 = vld [vmem:[%s1023_s2 + $0xc8] sm:$0xff]  ;;  %v345_v25 = vld [vmem:[%s1023_s2 + $0xb8] sm:$0xff]  ;;  %v970_v38 = vld [vmem:[%s1025_s4] sm:$0x77] }
  0x38   :  { %291 = vmatpush.msrb.mxu2 %v98_v42  ;;  %310 = vmatpush.msrb.mxu3 %v132_v43  ;;  %v323_v28 = vld [vmem:[%s1023_s2 + $0x8] sm:$0xff]  ;;  %v341_v32 = vld [vmem:[%s1023_s2 + $0x98] sm:$0xff]  ;;  %v154_v40 = vperm.slane %v970_v38, 0  ;;  %v408_v41 = vld [vmem:[%s1024_s3 + $0x60] sm:$0xff] }
  0x39   :  { %216 = vmatmul.f32.vlgmr.msra.gmra.mxu2 %v22_v44  ;;  %251 = vmatpush.msrb.mxu0 %v34_v45  ;;  %v343_v29 = vld [vmem:[%s1023_s2 + $0xa8] sm:$0xff]  ;;  %v411_v36 = vld [vmem:[%s1024_s3 + $0x78] sm:$0xff] }
  0x3a   :  { %270 = vmatpush.msrb.mxu1 %v68_v46  ;;  %292 = vmatpush.msrb.mxu2 %v96_v47  ;;  %v339_v34 = vld [vmem:[%s1023_s2 + $0x88] sm:$0xff]  ;;  %v407_v42 = vld [vmem:[%s1024_s3 + $0x58] sm:$0xff]  ;;  %v158_v43 = vperm.slane %v154_v40, 0 }
  0x3b   :  { %311 = vmatpush.msrb.mxu3 %v130_v48  ;;  %176 = vmatmul.f32.vlgmr.msra.gmra.mxu0 %v20_v49  ;;  %v409_v39 = vld [vmem:[%s1024_s3 + $0x68] sm:$0xff]  ;;  %v404_v48 = vld [vmem:[%s1024_s3 + $0x40] sm:$0xff] }
  0x3c   :  { %236 = vmatmul.f32.vlgmr.msra.gmra.mxu3 %v23_v50  ;;  %252 = vmatpush.msrb.mxu0 %v32_v51  ;;  %v405_v45 = vld [vmem:[%s1024_s3 + $0x48] sm:$0xff]  ;;  %v403_v51 = vld [vmem:[%s1024_s3 + $0x38] sm:$0xff] }
  0x3d   :  { %271 = vmatpush.msrb.mxu1 %v66_v52  ;;  %293 = vmatpush.msrb.mxu2 %v94_v53 }
  0x3e   :  { %312 = vmatpush.msrb.mxu3 %v128_v54  ;;  %196 = vmatmul.f32.vlgmr.msra.gmra.mxu1 %v21_v55 }
  0x3f   :  { %253 = vmatpush.msrb.mxu0 %v30_v56  ;;  %272 = vmatpush.msrb.mxu1 %v64_v57 }
  0x40   :  { %294 = vmatpush.msrb.mxu2 %v92_v58  ;;  %313 = vmatpush.msrb.mxu3 %v126_v59 }
  0x41   :  { %254 = vmatpush.msrb.mxu0 %v28_v60  ;;  %273 = vmatpush.msrb.mxu1 %v62_v61 }
  0x42   :  { %295 = vmatpush.msrb.mxu2 %v90_v62  ;;  %314 = vmatpush.msrb.mxu3 %v124_v63 }
  0x43   :  { %296 = vmatmul.f32.vlgmr.msrb.gmra.mxu2 %v22_v44  ;;  %255 = vmatpush.msrb.mxu0 %v26_v0  ;;  %v406_v44 = vld [vmem:[%s1024_s3 + $0x50] sm:$0xff] }
  0x44   :  { %274 = vmatpush.msrb.mxu1 %v60_v1  ;;  %315 = vmatpush.msrb.mxu3 %v122_v2 }
  0x45   :  { %256 = vmatmul.f32.vlgmr.msrb.gmra.mxu0 %v20_v49  ;;  %316 = vmatmul.f32.vlgmr.msrb.gmra.mxu3 %v23_v50  ;;  %v155_v50 = vperm.slane %v970_v38, 4 }
  0x46   :  { %275 = vmatpush.msrb.mxu1 %v58_v3  ;;  %355 = vmatpush.msra.mxu0 %v337_v4  ;;  %v402_v4 = vld [vmem:[%s1024_s3 + $0x30] sm:$0xff] }
  0x47   :  { %276 = vmatmul.f32.vlgmr.msrb.gmra.mxu1 %v21_v55  ;;  %413 = vmatpush.msra.mxu2 %v411_v36  ;;  %v159_v56 = vperm.slane %v155_v50, 0 }
  0x48   :  { %356 = vmatpush.msra.mxu0 %v336_v5  ;;  %375 = vmatpush.msra.mxu1 %v353_v6  ;;  %v401_v5 = vld [vmem:[%s1024_s3 + $0x28] sm:$0xff]  ;;  %v400_v6 = vld [vmem:[%s1024_s3 + $0x20] sm:$0xff] }
  0x49   :  { %414 = vmatpush.msra.mxu2 %v410_v37 }
  0x4a   :  { %357 = vmatpush.msra.mxu0 %v335_v7  ;;  %376 = vmatpush.msra.mxu1 %v352_v8  ;;  %v399_v7 = vld [vmem:[%s1024_s3 + $0x18] sm:$0xff]  ;;  %v398_v8 = vld [vmem:[%s1024_s3 + $0x10] sm:$0xff] }
  0x4b   :  { %415 = vmatpush.msra.mxu2 %v409_v39 }
  0x4c   :  { %358 = vmatpush.msra.mxu0 %v334_v9  ;;  %377 = vmatpush.msra.mxu1 %v351_v10  ;;  %v397_v9 = vld [vmem:[%s1024_s3 + $0x8] sm:$0xff]  ;;  %v396_v10 = vld [vmem:[%s1024_s3] sm:$0xff] }
  0x4d   :  { %416 = vmatpush.msra.mxu2 %v408_v41 }
  0x4e   :  { %359 = vmatpush.msra.mxu0 %v333_v11  ;;  %378 = vmatpush.msra.mxu1 %v350_v12  ;;  %v354_v11 = vperm.slane %v970_v38, 1 }
  0x4f   :  { %417 = vmatpush.msra.mxu2 %v407_v42 }
  0x50   :  { %360 = vmatpush.msra.mxu0 %v332_v13  ;;  %379 = vmatpush.msra.mxu1 %v349_v14 }
  0x51   :  { %418 = vmatpush.msra.mxu2 %v406_v44 }
  0x52   :  { %361 = vmatpush.msra.mxu0 %v331_v15  ;;  %380 = vmatpush.msra.mxu1 %v348_v16 }
  0x53   :  { %419 = vmatpush.msra.mxu2 %v405_v45 }
  0x54   :  { %362 = vmatpush.msra.mxu0 %v330_v17  ;;  %381 = vmatpush.msra.mxu1 %v347_v21  ;;  %v412_v17 = vperm.slane %v970_v38, 2 }
  0x55   :  { %420 = vmatpush.msra.mxu2 %v404_v48 }
  0x56   :  { %363 = vmatpush.msra.mxu0 %v329_v18  ;;  %382 = vmatpush.msra.mxu1 %v346_v23 }
  0x57   :  { %421 = vmatpush.msra.mxu2 %v403_v51 }
  0x58   :  { %364 = vmatpush.msra.mxu0 %v328_v19  ;;  %383 = vmatpush.msra.mxu1 %v345_v25 }
  0x59   :  { %422 = vmatpush.msra.mxu2 %v402_v4 }
  0x5a   :  { %365 = vmatpush.msra.mxu0 %v327_v20  ;;  %384 = vmatpush.msra.mxu1 %v344_v27 }
  0x5b   :  { %423 = vmatpush.msra.mxu2 %v401_v5 }
  0x5c   :  { %366 = vmatpush.msra.mxu0 %v326_v22  ;;  %385 = vmatpush.msra.mxu1 %v343_v29 }
  0x5d   :  { %424 = vmatpush.msra.mxu2 %v400_v6 }
  0x5e   :  { %367 = vmatpush.msra.mxu0 %v325_v24  ;;  %386 = vmatpush.msra.mxu1 %v342_v31 }
  0x5f   :  { %425 = vmatpush.msra.mxu2 %v399_v7 }
  0x60   :  { %368 = vmatpush.msra.mxu0 %v324_v26  ;;  %387 = vmatpush.msra.mxu1 %v341_v32 }
  0x61   :  { %426 = vmatpush.msra.mxu2 %v398_v8 }
  0x62   :  { %369 = vmatpush.msra.mxu0 %v323_v28  ;;  %388 = vmatpush.msra.mxu1 %v340_v33 }
  0x63   :  { %427 = vmatpush.msra.mxu2 %v397_v9 }
  0x64   :  { %370 = vmatpush.msra.mxu0 %v322_v30  ;;  %389 = vmatpush.msra.mxu1 %v339_v34 }
  0x65   :  { %428 = vmatpush.msra.mxu2 %v396_v10 }
  0x66   :  { %390 = vmatpush.msra.mxu1 %v338_v35 }
  0xb8   :  { %v177_v46 = vpop.f32.mrf.mxu0 }
  0xb9   :  { %v178_v47 = vadd.f32 %v177_v46, %v158_v43 }
  0xbb   :  { %v197_v49 = vpop.f32.mrf.mxu1 }
  0xbc   :  { %v198_v52 = vadd.f32 %v197_v49, %v178_v47  ;;  %v217_v53 = vpop.f32.mrf.mxu2 }
  0xbe   :  { %v218_v54 = vadd.f32 %v217_v53, %v198_v52 }
  0xbf   :  { %v237_v55 = vpop.f32.mrf.mxu3 }
  0xc0   :  { %v238_v57 = vadd.f32 %v237_v55, %v218_v54 }
  0xc2   :  { %v320_v58 = vmax.f32 %v238_v57, 0.0  ;;  %v257_v59 = vpop.f32.mrf.mxu0 }
  0xc3   :  { %v258_v60 = vadd.f32 %v257_v59, %v159_v56 }
  0xc4   :  { %v277_v61 = vpop.f32.mrf.mxu1  ;;  %371 = vmatmul.f32.vlgmr.msra.gmra.mxu0 %v320_v58 }
  0xc5   :  { %v278_v62 = vadd.f32 %v277_v61, %v258_v60 }
  0xc6   :  { %v297_v63 = vpop.f32.mrf.mxu2 }
  0xc7   :  { %v298_v0 = vadd.f32 %v297_v63, %v278_v62 }
  0xc8   :  { %v317_v1 = vpop.f32.mrf.mxu3 }
  0xc9   :  { %v318_v2 = vadd.f32 %v317_v1, %v298_v0 }
  0xcb   :  { %v321_v3 = vmax.f32 %v318_v2, 0.0 }
  0xcd   :  { %391 = vmatmul.f32.vlgmr.msra.gmra.mxu1 %v321_v3 }
 0x141   :  { %v372_v12 = vpop.f32.mrf.mxu0 }
 0x142   :  { %v373_v13 = vadd.f32 %v372_v12, %v354_v11 }
 0x14a   :  { %v392_v14 = vpop.f32.mrf.mxu1 }
 0x14b   :  { %v393_v15 = vadd.f32 %v392_v14, %v373_v13 }
 0x14d   :  { %v395_v16 = vmax.f32 %v393_v15, 0.0 }
 0x14f   :  { %429 = vmatmul.f32.vlgmr.msra.gmra.mxu2 %v395_v16 }
 0x1d2   :  { %v430_v18 = vpop.f32.mrf.mxu2 }
 0x1d3   :  { %v431_v19 = vadd.f32 %v430_v18, %v412_v17 }
 0x1d5   :  { %v433_v20 = vmax.f32 %v431_v19, 0.0 }
 0x1d7   :  { %434 = vst [vmem:[%s1026_s5] sm:$0xff] %v433_v20 }

</bundles_post_ra>
